<compile_context>
chip_gen: v5e
topology: v5e:2x2
jax: 0.10.0
libtpu: 0.0.40
codegen_flags: <defaults>
</compile_context>

<pallas_src>
import jax
import jax.numpy as jnp
from jax.experimental import pallas as pl
from jax.experimental.pallas import tpu as pltpu


def ae_kernel(x_ref, w_enc_ref, b_enc_ref, w_dec_ref, b_dec_ref, out_ref):
    # Encoder: Linear(D_in -> D_lat) + ReLU. bf16 MXU matmul, f32 accumulation.
    x = x_ref[...]
    h = jnp.dot(x, w_enc_ref[...], preferred_element_type=jnp.float32)
    h = h + b_enc_ref[...]            # (1, D_lat) broadcasts over the TB rows
    z = jnp.maximum(h, 0.0)           # ReLU (VPU)

    # Decoder: Linear(D_lat -> D_in). z stays in vregs/VMEM; never hits HBM.
    y = jnp.dot(z.astype(w_dec_ref.dtype), w_dec_ref[...],
                preferred_element_type=jnp.float32)
    y = y + b_dec_ref[...]            # (1, D_in)

    out_ref[...] = y.astype(out_ref.dtype)


def ae_forward(x, w_enc, b_enc, w_dec, b_dec, *,
               block_b=None, compute_dtype=jnp.bfloat16):
    B, D_in = x.shape
    D_lat = w_enc.shape[1]

    # ---- tile size over the batch (multiple of 8, evenly divides B) ----
    if block_b is None:
        block_b = 256
    tb = min(block_b, B)
    while tb > 8 and (B % tb != 0 or tb % 8 != 0):
        tb -= 8
    if B % tb != 0 or tb % 8 != 0:
        tb = B  # single full-extent block; full-array blocks bypass tiling rules

    grid = (B // tb,)

    # ---- cast operands: bf16 into the MXU, f32 bias / accumulation / output ----
    x_c = x.astype(compute_dtype)
    w_enc_c = w_enc.astype(compute_dtype)
    w_dec_c = w_dec.astype(compute_dtype)
    b_enc_f = b_enc.astype(jnp.float32)
    b_dec_f = b_dec.astype(jnp.float32)

    # ---- VMEM budget: resident weights + double-buffered x/out tiles + temps ----
    itemsize_c = jnp.dtype(compute_dtype).itemsize
    bytes_w = ((D_in * D_lat + D_lat * D_in) * itemsize_c
               + (D_lat + D_in) * 4)
    bytes_x_buf = 2 * tb * D_in * itemsize_c        # double-buffered input tile
    bytes_o_buf = 2 * tb * D_in * 4                 # double-buffered f32 output tile
    bytes_tmp = tb * D_lat * 4 + tb * D_in * 4      # h/z and y intermediates
    vmem_budget = int(2 * (bytes_w + bytes_x_buf + bytes_o_buf + bytes_tmp))
    vmem_budget = max(vmem_budget, 4 << 20)
    vmem_budget = min(vmem_budget, 48 << 20)        # headroom under v7x's 64 MiB

    cost = pl.CostEstimate(
        flops=2 * B * D_in * D_lat * 2,             # two matmuls
        transcendentals=0,
        bytes_accessed=(x_c.size * itemsize_c
                        + (w_enc_c.size + w_dec_c.size) * itemsize_c
                        + (b_enc_f.size + b_dec_f.size) * 4
                        + B * D_in * 4),
    )

    return pl.pallas_call(
        ae_kernel,
        out_shape=jax.ShapeDtypeStruct((B, D_in), jnp.float32),
        grid=grid,
        in_specs=[
            pl.BlockSpec((tb, D_in), lambda i: (i, 0)),       # x: tiled over batch
            pl.BlockSpec((D_in, D_lat), lambda i: (0, 0)),    # w_enc: resident
            pl.BlockSpec((1, D_lat), lambda i: (0, 0)),       # b_enc: resident
            pl.BlockSpec((D_lat, D_in), lambda i: (0, 0)),    # w_dec: resident
            pl.BlockSpec((1, D_in), lambda i: (0, 0)),        # b_dec: resident
        ],
        out_specs=pl.BlockSpec((tb, D_in), lambda i: (i, 0)),
        compiler_params=pltpu.CompilerParams(
            dimension_semantics=("parallel",),
            vmem_limit_bytes=vmem_budget,
        ),
        cost_estimate=cost,
    )(x_c, w_enc_c, b_enc_f, w_dec_c, b_dec_f)


def reference_forward(x, w_enc, b_enc, w_dec, b_dec, compute_dtype=jnp.bfloat16):
    # Same numerics as the kernel: bf16 operands, f32 accumulation/bias/output.
    xc = x.astype(compute_dtype)
    we = w_enc.astype(compute_dtype)
    wd = w_dec.astype(compute_dtype)
    h = jnp.dot(xc, we, preferred_element_type=jnp.float32) + b_enc.astype(jnp.float32)
    z = jnp.maximum(h, 0.0)
    y = (jnp.dot(z.astype(compute_dtype), wd, preferred_element_type=jnp.float32)
         + b_dec.astype(jnp.float32))
    return y


if __name__ == "__main__":
    key = jax.random.PRNGKey(0)
    k_x, k_we, k_be, k_wd, k_bd = jax.random.split(key, 5)

    # Lane-dense sizing: feature dims are multiples of 128, batch a multiple of 8.
    B, D_in, D_lat = 1024, 256, 128   # grid of 4 batch tiles of 256 rows

    x = jax.random.normal(k_x, (B, D_in), dtype=jnp.float32)

    # Deterministic synthetic parameters (shapes follow the two Linear layers).
    w_enc = jax.random.normal(k_we, (D_in, D_lat), dtype=jnp.float32) * 0.05
    b_enc = jax.random.normal(k_be, (1, D_lat), dtype=jnp.float32) * 0.01
    w_dec = jax.random.normal(k_wd, (D_lat, D_in), dtype=jnp.float32) * 0.05
    b_dec = jax.random.normal(k_bd, (1, D_in), dtype=jnp.float32) * 0.01

    out = ae_forward(x, w_enc, b_enc, w_dec, b_dec)
    jax.block_until_ready(out)

    ref = reference_forward(x, w_enc, b_enc, w_dec, b_dec)
    assert out.shape == (B, D_in), out.shape
    assert out.dtype == jnp.float32, out.dtype
    assert jnp.allclose(out, ref, atol=2e-2, rtol=2e-2), "mismatch vs reference"

    print("KERNEL_OK")
</pallas_src>

<mosaic_0001>
module attributes {stable_mosaic.version = 11 : i64} {
  func.func @ae_kernel(%arg0: i32, %arg1: memref<256x256xbf16, #tpu.memory_space<vmem>>, %arg2: memref<256x128xbf16, #tpu.memory_space<vmem>>, %arg3: memref<1x128xf32, #tpu.memory_space<vmem>>, %arg4: memref<128x256xbf16, #tpu.memory_space<vmem>>, %arg5: memref<1x256xf32, #tpu.memory_space<vmem>>, %arg6: memref<256x256xf32, #tpu.memory_space<vmem>>) attributes {dimension_semantics = [#tpu.dimension_semantics<parallel>], iteration_bounds = array<i64: 4>, scalar_prefetch = 0 : i64, scratch_operands = 0 : i64, tpu.core_type = #tpu.core_type<tc>, window_params = [{transform_indices = @transform_0, window_bounds = array<i64: 256, 256>}, {pipeline_mode = #tpu.pipeline_mode<synchronous>, transform_indices = @transform_1, window_bounds = array<i64: 256, 128>}, {pipeline_mode = #tpu.pipeline_mode<synchronous>, transform_indices = @transform_2, window_bounds = array<i64: 1, 128>}, {pipeline_mode = #tpu.pipeline_mode<synchronous>, transform_indices = @transform_3, window_bounds = array<i64: 128, 256>}, {pipeline_mode = #tpu.pipeline_mode<synchronous>, transform_indices = @transform_4, window_bounds = array<i64: 1, 256>}, {transform_indices = @transform_5, window_bounds = array<i64: 256, 256>}]} {
    %c0 = arith.constant 0 : index
    %c0_0 = arith.constant 0 : index
    %0 = vector.load %arg1[%c0, %c0_0] : memref<256x256xbf16, #tpu.memory_space<vmem>>, vector<256x256xbf16>
    %c0_1 = arith.constant 0 : index
    %c0_2 = arith.constant 0 : index
    %1 = vector.load %arg2[%c0_1, %c0_2] : memref<256x128xbf16, #tpu.memory_space<vmem>>, vector<256x128xbf16>
    %cst = arith.constant dense<0.000000e+00> : vector<256x128xf32>
    %2 = tpu.matmul %0, %1, %cst {dimension_numbers = #tpu.dot_dimension_numbers<[1], [0], [0], [1], [0, 0, 1, 1], [], []>} : vector<256x256xbf16>, vector<256x128xbf16>, vector<256x128xf32> -> vector<256x128xf32>
    %c0_3 = arith.constant 0 : index
    %c0_4 = arith.constant 0 : index
    %3 = vector.load %arg3[%c0_3, %c0_4] : memref<1x128xf32, #tpu.memory_space<vmem>>, vector<1x128xf32>
    %4 = vector.broadcast %3 : vector<1x128xf32> to vector<256x128xf32>
    %5 = arith.addf %2, %4 : vector<256x128xf32>
    %cst_5 = arith.constant 0.000000e+00 : f32
    %6 = vector.broadcast %cst_5 : f32 to vector<256x128xf32>
    %7 = arith.maximumf %5, %6 : vector<256x128xf32>
    %8 = arith.truncf %7 : vector<256x128xf32> to vector<256x128xbf16>
    %c0_6 = arith.constant 0 : index
    %c0_7 = arith.constant 0 : index
    %9 = vector.load %arg4[%c0_6, %c0_7] : memref<128x256xbf16, #tpu.memory_space<vmem>>, vector<128x256xbf16>
    %cst_8 = arith.constant dense<0.000000e+00> : vector<256x256xf32>
    %10 = tpu.matmul %8, %9, %cst_8 {dimension_numbers = #tpu.dot_dimension_numbers<[1], [0], [0], [1], [0, 0, 1, 1], [], []>} : vector<256x128xbf16>, vector<128x256xbf16>, vector<256x256xf32> -> vector<256x256xf32>
    %c0_9 = arith.constant 0 : index
    %c0_10 = arith.constant 0 : index
    %11 = vector.load %arg5[%c0_9, %c0_10] : memref<1x256xf32, #tpu.memory_space<vmem>>, vector<1x256xf32>
    %12 = vector.broadcast %11 : vector<1x256xf32> to vector<256x256xf32>
    %13 = arith.addf %10, %12 : vector<256x256xf32>
    %c0_11 = arith.constant 0 : index
    %c0_12 = arith.constant 0 : index
    %14 = vector.load %arg6[%c0_11, %c0_12] : memref<256x256xf32, #tpu.memory_space<vmem>>, vector<256x256xf32>
    tpu.vector_store %arg6[%c0_11, %c0_12], %13 {strides = array<i32>} : memref<256x256xf32, #tpu.memory_space<vmem>>, vector<256x256xf32>,
    return
  }
  func.func @transform_0(%arg0: i32) -> (i32, i32) {
    %c0_i32 = arith.constant 0 : i32
    %c0_i32_0 = arith.constant 0 : i32
    return %arg0, %c0_i32 : i32, i32
  }
  func.func @transform_1(%arg0: i32) -> (i32, i32) {
    %c0_i32 = arith.constant 0 : i32
    %c0_i32_0 = arith.constant 0 : i32
    %c0_i32_1 = arith.constant 0 : i32
    return %c0_i32, %c0_i32_0 : i32, i32
  }
  func.func @transform_2(%arg0: i32) -> (i32, i32) {
    %c0_i32 = arith.constant 0 : i32
    %c0_i32_0 = arith.constant 0 : i32
    %c0_i32_1 = arith.constant 0 : i32
    return %c0_i32, %c0_i32_0 : i32, i32
  }
  func.func @transform_3(%arg0: i32) -> (i32, i32) {
    %c0_i32 = arith.constant 0 : i32
    %c0_i32_0 = arith.constant 0 : i32
    %c0_i32_1 = arith.constant 0 : i32
    return %c0_i32, %c0_i32_0 : i32, i32
  }
  func.func @transform_4(%arg0: i32) -> (i32, i32) {
    %c0_i32 = arith.constant 0 : i32
    %c0_i32_0 = arith.constant 0 : i32
    %c0_i32_1 = arith.constant 0 : i32
    return %c0_i32, %c0_i32_0 : i32, i32
  }
  func.func @transform_5(%arg0: i32) -> (i32, i32) {
    %c0_i32 = arith.constant 0 : i32
    %c0_i32_0 = arith.constant 0 : i32
    return %arg0, %c0_i32 : i32, i32
  }
}

</mosaic_0001>

<bundles_post_ra>
// kernel: tpu_custom_call.1
= control target key start
LH: loop header
LB: loop body
LE: loop exit
PB: predicated region body
PF: predicated region fallthrough
CT: control target
= control target key end

     0   :  { %10 = vsyncpa [#allocation3], 0  ;;  %s2289_s0 = inlined_call_operand.hbm [shape: bf16[1024,256], index: 0, kind: input, shape index: {}]   ;;  %s2290_s1 = inlined_call_operand.hbm [shape: bf16[256,128], index: 1, kind: input, shape index: {}]   ;;  %s2291_s2 = inlined_call_operand.vmem [shape: f32[1,128], index: 2, kind: input, shape index: {}]   ;;  %s2292_s3 = inlined_call_operand.hbm [shape: bf16[128,256], index: 3, kind: input, shape index: {}]   ;;  %s2293_s4 = inlined_call_operand.vmem [shape: f32[1,256], index: 4, kind: input, shape index: {}]   ;;  %s2294_s5 = inlined_call_operand.hbm [shape: f32[1024,256], index: 5, kind: output, shape index: {}]  }
   0x1   :  { %12 = vsyncpa [#allocation3 + $0x1], 0 }
   0x2   :  { %13 = vsyncpa [#allocation6], 0 }
   0x3   :  { %14 = vsyncpa [#allocation4], 0 }
   0x4   :  { %16 = vsyncpa [#allocation4 + $0x1], 0  ;;  %s1902_s18 = smov 0   ;;  %s1904_s19 = smov 0  }
   0x5   :  { %s1906_s20 = smov 0   ;;  %s1908_s21 = smov 0  }
   0x6 LB: > { %s1923_s22 = sadd.s32 4294967295, %s1862_s21   ;;  %s1284_s23 = sadd.s32 4294967294, %s1862_s21   ;;  %s1862_s21 = sphi %s1908_s21, %s2305_s21   ;;  %s1858_s20 = sphi %s1906_s20, %s2304_s20   ;;  %s1854_s19 = sphi %s1904_s19, %s2303_s19   ;;  %s1850_s18 = sphi %s1902_s18, %s2302_s18  }
   0x7   : > { %p42_p0 = scmp.ne.s32.totalorder %s1854_s19, %s1850_s18  ;;  %p43_p1 = scmp.eq.s32.totalorder %s1923_s22, 0 }
   0x8   : > { %p150_p2 = scmp.eq.s32.totalorder %s1923_s22, 3  ;;  %p156_p3 = scmp.eq.s32.totalorder %s1284_s23, 3 }
   0x9   : > { %p1932_p4 = por %p43_p1, %p42_p0  ;;  %p1285_p5 = scmp.ge.s32.totalorder %s1862_s21, 1 }
   0xa   : > { %p1937_p6 = por %p156_p3, %p42_p0  ;;  %p163_p7 = scmp.lt.s32.totalorder %s1862_s21, 5 }
   0xb   : > { %s174_s28 = sshll.u32 %s2290_s1, 4  ;;  %s1864_s30 = smov [#allocation5]   ;;  %s175_s28 = int_to_ptr.hbm [resolvable:$true] %s174_s28 }
   0xc   : > { %p1945_p8 = pnand %p1285_p5, %p163_p7  ;;  %s176_s6 = sshll.u32 %s1864_s30, 4  ;;  %s177_s6 = int_to_ptr.vmem [resolvable:$true] %s176_s6 }
   0xd   : > { %s191_s9 = sshll.u32 %s2292_s3, 4  ;;  %s1865_s10 = smov 64   ;;  %s192_s9 = int_to_ptr.hbm [resolvable:$true] %s191_s9 }
   0xe   : > { %p1640_p9 = pneg %p1945_p8  ;;  %s1866_s11 = smov 4  }
   0xf   : > { %s1867_s12 = smov [#allocation7]   ;;  %s2295_s14 = smov 128  }
  0x10   : > { %p1641_p10 = pnand %p1640_p9, %p43_p1  ;;  %s193_s13 = sshll.u32 %s1867_s12, 4  ;;  %s194_s13 = int_to_ptr.vmem [resolvable:$true] %s193_s13 }
  0x11   : > { %s1869_s15 = smov 8   ;;  %s1960_s16 = sadd.s32 1, %s1862_s21  }
  0x12   : > { %1643 = dma.hbm_to_vmem [thread:$0]  (!%p1641_p10), %s175_s28, 2048, %s177_s6, [#allocation6], %s1865_s10, %s1865_s10, %s1866_s11  }
  0x13   : > { %1646 = dma.hbm_to_vmem [thread:$0]  (!%p1641_p10), %s192_s9, 2048, %s194_s13, [#allocation6], %s2295_s14, %s2295_s14, %s1869_s15  }
  0x14   : > { %s26_s17 = ssub.s32 %s1862_s21, %s1960_s16  ;;  %s29_s23 = sadd.s32 1, %s1858_s20 }
  0x15   : > { %p27_p11 = scmp.eq.s32.totalorder %s26_s17, 0  ;;  %p36_p12 = scmp.ne.s32.totalorder %s1858_s20, %s1854_s19 }
  0x16   : > { %p37_p13 = scmp.eq.s32.totalorder %s1862_s21, 0  ;;  %p1657_p5 = scmp.lt.s32.totalorder %s1862_s21, 4 }
  0x17   : > { %s1969_s26 = scalar_select %p27_p11, %s1858_s20, %s29_s23  }
  0x18   : > { %p38_p0 = por %p37_p13, %p36_p12  ;;  %p1973_p3 = por %p150_p2, %p36_p12 }
  0x19   : > { %s210_s28 = sand.u32 1, %s1858_s20   ;;  %s1561_s6 = sshll.u32 %s1862_s21, 8 }
  0x1a   : > { %s1289_s30 = sshll.u32 %s210_s28, 8  ;;  %s220_s9 = scalar_lea.hbm %s2289_s0, %s1561_s6 }
  0x1b   : > { %s214_s10 = scalar_lea.vmem [#allocation2], %s1289_s30  ;;  %s221_s12 = sshll.u32 %s220_s9, 4  ;;  %s222_s12 = int_to_ptr.hbm [resolvable:$true] %s221_s12 }
  0x1c   : > { %s223_s11 = sshll.u32 %s214_s10, 4  ;;  %p1983_p7 = pnand %p1657_p5, %p38_p0  ;;  %s224_s11 = int_to_ptr.vmem [resolvable:$true] %s223_s11 }
  0x1d   : > { %s211_s17 = scalar_lea.sflag [#allocation3], %s210_s28  ;;  %s1762_s23 = sshra.s32 %s222_s12, 4  ;;  %s1763_s23 = int_to_ptr.hbm [resolvable:$true] %s1762_s23 }
  0x1e   : > { %s1764_s14 = scalar_lea.hbm %s1763_s23, 256  ;;  %p1766_p9 = pneg %p1983_p7 }
  0x1f   : > { %p1765_p2 = scmp.ne.s32.totalorder %s1763_s23, %s1764_s14  ;;  %s1769_s7 = scalar_lea.hbm %s2289_s0, 1024 }
  0x20   : > { %p1770_p12 = scmp.lt.s32.totalorder %s1763_s23, %s2289_s0  ;;  %p1771_p13 = scmp.lt.s32.totalorder %s1769_s7, %s1764_s14 }
  0x21   : > { %p1767_p10 = pnand %p1766_p9, %p1765_p2 }
  0x22   : > { %p1772_p0 = por %p1771_p13, %p1770_p12 }
  0x23   : > { %p1768_p11 = pneg %p1767_p10 }
  0x25   : > { %p1773_p5 = pnand %p1772_p0, %p1768_p11 }
  0x27   : > { %1776 = shalt.err (!%p1773_p5)
}
  0x28   : > { %s2301_s28 = smov 128   ;;  %235 = sbr.rel (%p1945_p8) target bundleno = 609 (0x261), region = 40 }
  0x29   : > { %1650 = dma.hbm_to_vmem [thread:$0]  (!%p1983_p7), %s222_s12, 4096, %s224_s11, %s211_s17, %s2301_s28, %s2301_s28, %s1869_s15  }
  0x2a   : > { %s2003_s10 = sand.u32 (!%p1945_p8), 1, %s1854_s19  }
  0x2b   : > { %s1294_s23 = sshll.u32 (!%p1945_p8), %s2003_s10, 8  ;;  %s238_s14 = scalar_lea.sflag (!%p1945_p8), [#allocation3], %s2003_s10 }
  0x2c   : > { %s2007_s6 = scalar_lea.vmem (!%p1945_p8), [#allocation2], %s1294_s23 }
  0x2d   : > { %1837 = dma.done.wait (%p1932_p4), %s238_s14, 4096  }
  0x2e   : > { %1839 = vsyncadd (%p1932_p4), %s238_s14, 4294963200 }
  0x2f   : > { %1841 = dma.done.wait (%p43_p1), [#allocation6], 4096  }
  0x30   : > { %1843 = vsyncadd (%p43_p1), [#allocation6], 4294963200  ;;  %v1601_v0 = vld [vmem:[#allocation5 + $0x38] sm:$0xff]  ;;  %v1600_v2 = vld [vmem:[#allocation5 + $0x30] sm:$0xff]  ;;  %s1297_s12 = sshll.u32 %s2003_s10, 9  ;;  %s1627_s17 = sshll.u32 %s1923_s22, 9 }
  0x31   : > { %v1609_v1 = vld [vmem:[#allocation5 + $0x78] sm:$0xff]  ;;  %605 = vmatpush.bf16.msra.mxu0 %v1601_v0  ;;  %v1608_v3 = vld [vmem:[#allocation5 + $0x70] sm:$0xff]  ;;  %v1599_v4 = vld [vmem:[#allocation5 + $0x28] sm:$0xff]  ;;  %s2115_s13 = scalar_lea.vmem [#allocation8], %s1297_s12  ;;  %s1188_s8 = scalar_lea.hbm %s2294_s5, %s1627_s17 }
  0x32   : > { %694 = vmatpush.bf16.msra.mxu1 %v1609_v1  ;;  %v1607_v5 = vld [vmem:[#allocation5 + $0x68] sm:$0xff]  ;;  %v1598_v6 = vld [vmem:[#allocation5 + $0x20] sm:$0xff]  ;;  %v1597_v8 = vld [vmem:[#allocation5 + $0x18] sm:$0xff]  ;;  %s1189_s9 = sshll.u32 %s2115_s13, 4  ;;  %s1191_s28 = sshll.u32 %s1188_s8, 4  ;;  %s1190_s9 = int_to_ptr.vmem [resolvable:$true] %s1189_s9  ;;  %s1192_s28 = int_to_ptr.hbm [resolvable:$true] %s1191_s28 }
  0x33   : > { %v1606_v7 = vld [vmem:[#allocation5 + $0x60] sm:$0xff]  ;;  %v1605_v9 = vld [vmem:[#allocation5 + $0x58] sm:$0xff]  ;;  %v1596_v10 = vld [vmem:[#allocation5 + $0x10] sm:$0xff]  ;;  %s1176_s22 = scalar_lea.sflag [#allocation4], %s2003_s10  ;;  %s1806_s23 = sshra.s32 %s1192_s28, 4  ;;  %s1807_s23 = int_to_ptr.hbm [resolvable:$true] %s1806_s23 }
  0x34   : > { %v1604_v11 = vld [vmem:[#allocation5 + $0x50] sm:$0xff]  ;;  %v1595_v12 = vld [vmem:[#allocation5 + $0x8] sm:$0xff]  ;;  %v1594_v14 = vld [vmem:[#allocation5] sm:$0xff]  ;;  %s1808_s14 = scalar_lea.hbm %s1807_s23, 512  ;;  %s1812_s29 = scalar_lea.hbm %s2294_s5, 2048 }
  0x35   : > { %606 = vmatpush.bf16.msra.mxu0 %v1600_v2  ;;  %v1603_v13 = vld [vmem:[#allocation5 + $0x48] sm:$0xff]  ;;  %v1602_v15 = vld [vmem:[#allocation5 + $0x40] sm:$0xff]  ;;  %v1308_v22 = vld [vmem:[%s2007_s6 + $0x10] sm:$0xf]  ;;  %p1809_p1 = scmp.ne.s32.totalorder %s1807_s23, %s1808_s14  ;;  %p1813_p7 = scmp.lt.s32.totalorder %s1807_s23, %s2294_s5 }
  0x36   : > { %695 = vmatpush.bf16.msra.mxu1 %v1608_v3  ;;  %v1300_v16 = vld [vmem:[%s2007_s6] sm:$0xf]  ;;  %v1563_v17 = vld [vmem:[%s2007_s6 + $0x4] sm:$0xf0]  ;;  %v1562_v18 = vld [vmem:[%s2007_s6 + $0x4] sm:$0xf]  ;;  %p1814_p2 = scmp.lt.s32.totalorder %s1812_s29, %s1808_s14 }
  0x37   : > { %v1302_v19 = vld [vmem:[%s2007_s6 + $0x8] sm:$0xf0]  ;;  %v1301_v20 = vor.u32 %v1563_v17, %v1300_v16  ;;  %v1565_v23 = vld [vmem:[%s2007_s6 + $0x14] sm:$0xf0]  ;;  %v1564_v24 = vld [vmem:[%s2007_s6 + $0x14] sm:$0xf]  ;;  %p1810_p4 = pnand %p1809_p1, %p1973_p3 }
  0x38   : > { %v1305_v21 = vor.u32 %v1562_v18, %v1302_v19  ;;  %v1310_v25 = vld [vmem:[%s2007_s6 + $0x18] sm:$0xf0]  ;;  %v1309_v26 = vor.u32 %v1565_v23, %v1308_v22  ;;  %v1316_v28 = vld [vmem:[%s2007_s6 + $0x20] sm:$0xf]  ;;  %v1567_v29 = vld [vmem:[%s2007_s6 + $0x24] sm:$0xf0]  ;;  %p1815_p9 = por %p1814_p2, %p1813_p7 }
  0x39   : > { %607 = vmatpush.bf16.msra.mxu0 %v1599_v4  ;;  %v1313_v27 = vor.u32 %v1564_v24, %v1310_v25  ;;  %v1566_v30 = vld [vmem:[%s2007_s6 + $0x24] sm:$0xf]  ;;  %v1318_v31 = vld [vmem:[%s2007_s6 + $0x28] sm:$0xf0]  ;;  %v1317_v32 = vor.u32 %v1567_v29, %v1316_v28  ;;  %v1324_v34 = vld [vmem:[%s2007_s6 + $0x30] sm:$0xf]  ;;  %p1811_p8 = pneg %p1810_p4 }
  0x3a   : > { %696 = vmatpush.bf16.msra.mxu1 %v1607_v5  ;;  %v1321_v33 = vor.u32 %v1566_v30, %v1318_v31  ;;  %v1569_v35 = vld [vmem:[%s2007_s6 + $0x34] sm:$0xf0]  ;;  %v1568_v36 = vld [vmem:[%s2007_s6 + $0x34] sm:$0xf]  ;;  %v1326_v37 = vld [vmem:[%s2007_s6 + $0x38] sm:$0xf0] }
  0x3b   : > { %v1325_v38 = vor.u32 %v1569_v35, %v1324_v34  ;;  %v1329_v39 = vor.u32 %v1568_v36, %v1326_v37  ;;  %v1332_v40 = vld [vmem:[%s2007_s6 + $0x40] sm:$0xf]  ;;  %v1571_v41 = vld [vmem:[%s2007_s6 + $0x44] sm:$0xf0]  ;;  %v1570_v42 = vld [vmem:[%s2007_s6 + $0x44] sm:$0xf]  ;;  %p1816_p10 = pnand %p1815_p9, %p1811_p8 }
  0x3c   : > { %v1334_v43 = vld [vmem:[%s2007_s6 + $0x48] sm:$0xf0]  ;;  %v1333_v44 = vor.u32 %v1571_v41, %v1332_v40  ;;  %v1548_v46 = vld [vmem:[#allocation7 + $0x70] sm:$0xf]  ;;  %v1625_v47 = vld [vmem:[#allocation7 + $0x74] sm:$0xf0] }
  0x3d   : > { %608 = vmatpush.bf16.msra.mxu0 %v1598_v6  ;;  %v1337_v45 = vor.u32 %v1570_v42, %v1334_v43  ;;  %v1624_v48 = vld [vmem:[#allocation7 + $0x74] sm:$0xf]  ;;  %v1549_v49 = vor.u32 %v1625_v47, %v1548_v46  ;;  %v1550_v50 = vld [vmem:[#allocation7 + $0x78] sm:$0xf0]  ;;  %v1340_v52 = vld [vmem:[%s2007_s6 + $0x50] sm:$0xf] }
  0x3e   : > { %697 = vmatpush.bf16.msra.mxu1 %v1606_v7  ;;  %v1553_v51 = vor.u32 %v1624_v48, %v1550_v50  ;;  %v1573_v53 = vld [vmem:[%s2007_s6 + $0x54] sm:$0xf0]  ;;  %v1572_v54 = vld [vmem:[%s2007_s6 + $0x54] sm:$0xf]  ;;  %v1342_v55 = vld [vmem:[%s2007_s6 + $0x58] sm:$0xf0] }
  0x3f   : > { %933 = vmatpush.bf16.msra.mxu2 %v1549_v49  ;;  %v1341_v56 = vor.u32 %v1573_v53, %v1340_v52  ;;  %v1345_v57 = vor.u32 %v1572_v54, %v1342_v55  ;;  %v1540_v58 = vld [vmem:[#allocation7 + $0x60] sm:$0xf]  ;;  %v1623_v59 = vld [vmem:[#allocation7 + $0x64] sm:$0xf0]  ;;  %v1622_v60 = vld [vmem:[#allocation7 + $0x64] sm:$0xf] }
  0x40   : > { %1022 = vmatpush.bf16.msra.mxu3 %v1553_v51  ;;  %v1541_v61 = vor.u32 %v1623_v59, %v1540_v58  ;;  %v1542_v62 = vld [vmem:[#allocation7 + $0x68] sm:$0xf0]  ;;  %v1532_v63 = vld [vmem:[#allocation7 + $0x50] sm:$0xf]  ;;  %v1621_v0 = vld [vmem:[#allocation7 + $0x54] sm:$0xf0] }
  0x41   : > { %609 = vmatpush.bf16.msra.mxu0 %v1597_v8  ;;  %v1545_v1 = vor.u32 %v1622_v60, %v1542_v62  ;;  %v1620_v2 = vld [vmem:[#allocation7 + $0x54] sm:$0xf]  ;;  %v1534_v3 = vld [vmem:[#allocation7 + $0x58] sm:$0xf0]  ;;  %v1533_v4 = vor.u32 %v1621_v0, %v1532_v63  ;;  %v1524_v6 = vld [vmem:[#allocation7 + $0x40] sm:$0xf] }
  0x42   : > { %698 = vmatpush.bf16.msra.mxu1 %v1605_v9  ;;  %v1537_v5 = vor.u32 %v1620_v2, %v1534_v3  ;;  %v1619_v7 = vld [vmem:[#allocation7 + $0x44] sm:$0xf0]  ;;  %v1618_v8 = vld [vmem:[#allocation7 + $0x44] sm:$0xf]  ;;  %v1526_v9 = vld [vmem:[#allocation7 + $0x48] sm:$0xf0] }
  0x43   : > { %934 = vmatpush.bf16.msra.mxu2 %v1541_v61  ;;  %v1516_v18 = vld [vmem:[#allocation7 + $0x30] sm:$0xf]  ;;  %v1617_v19 = vld [vmem:[#allocation7 + $0x34] sm:$0xf0]  ;;  %v1518_v22 = vld [vmem:[#allocation7 + $0x38] sm:$0xf0] }
  0x44   : > { %1023 = vmatpush.bf16.msra.mxu3 %v1545_v1  ;;  %v1508_v24 = vld [vmem:[#allocation7 + $0x20] sm:$0xf]  ;;  %v1615_v25 = vld [vmem:[#allocation7 + $0x24] sm:$0xf0]  ;;  %v1510_v28 = vld [vmem:[#allocation7 + $0x28] sm:$0xf0] }
  0x45   : > { %610 = vmatpush.bf16.msra.mxu0 %v1596_v10  ;;  %v1525_v10 = vor.u32 %v1619_v7, %v1524_v6  ;;  %v1500_v30 = vld [vmem:[#allocation7 + $0x10] sm:$0xf]  ;;  %v1613_v31 = vld [vmem:[#allocation7 + $0x14] sm:$0xf0]  ;;  %v1502_v34 = vld [vmem:[#allocation7 + $0x18] sm:$0xf0] }
  0x46   : > { %699 = vmatpush.bf16.msra.mxu1 %v1604_v11  ;;  %v1348_v11 = vld [vmem:[%s2007_s6 + $0x60] sm:$0xf]  ;;  %v1356_v36 = vld [vmem:[%s2007_s6 + $0x70] sm:$0xf]  ;;  %v1577_v37 = vld [vmem:[%s2007_s6 + $0x74] sm:$0xf0] }
  0x47   : > { %935 = vmatpush.bf16.msra.mxu2 %v1533_v4  ;;  %v1610_v40 = vld [vmem:[#allocation7 + $0x4] sm:$0xf]  ;;  %v1576_v41 = vld [vmem:[%s2007_s6 + $0x74] sm:$0xf]  ;;  %v1358_v42 = vld [vmem:[%s2007_s6 + $0x78] sm:$0xf0]  ;;  %v1357_v46 = vor.u32 %v1577_v37, %v1356_v36 }
  0x48   : > { %1024 = vmatpush.bf16.msra.mxu3 %v1537_v5  ;;  %v1361_v47 = vor.u32 %v1576_v41, %v1358_v42  ;;  %v1364_v48 = vld [vmem:[%s2007_s6 + $0x80] sm:$0xf]  ;;  %v1579_v49 = vld [vmem:[%s2007_s6 + $0x84] sm:$0xf0]  ;;  %v1578_v50 = vld [vmem:[%s2007_s6 + $0x84] sm:$0xf] }
  0x49   : > { %611 = vmatpush.bf16.msra.mxu0 %v1595_v12  ;;  %v1529_v12 = vor.u32 %v1618_v8, %v1526_v9  ;;  %v1366_v51 = vld [vmem:[%s2007_s6 + $0x88] sm:$0xf0]  ;;  %v1365_v52 = vor.u32 %v1579_v49, %v1364_v48  ;;  %v1372_v63 = vld [vmem:[%s2007_s6 + $0x90] sm:$0xf]  ;;  %v1581_v0 = vld [vmem:[%s2007_s6 + $0x94] sm:$0xf0] }
  0x4a   : > { %700 = vmatpush.bf16.msra.mxu1 %v1603_v13  ;;  %v1575_v13 = vld [vmem:[%s2007_s6 + $0x64] sm:$0xf0]  ;;  %v1369_v53 = vor.u32 %v1578_v50, %v1366_v51  ;;  %v1580_v1 = vld [vmem:[%s2007_s6 + $0x94] sm:$0xf]  ;;  %v1374_v2 = vld [vmem:[%s2007_s6 + $0x98] sm:$0xf0]  ;;  %v1373_v6 = vor.u32 %v1581_v0, %v1372_v63 }
  0x4b   : > { %936 = vmatpush.bf16.msra.mxu2 %v1525_v10  ;;  %v1349_v16 = vor.u32 %v1575_v13, %v1348_v11  ;;  %v1377_v7 = vor.u32 %v1580_v1, %v1374_v2  ;;  %v1390_v36 = vld [vmem:[%s2007_s6 + $0xb8] sm:$0xf0]  ;;  %v1396_v50 = vld [vmem:[%s2007_s6 + $0xc0] sm:$0xf]  ;;  %v1587_v51 = vld [vmem:[%s2007_s6 + $0xc4] sm:$0xf0] }
  0x4c   : > { %1025 = vmatpush.bf16.msra.mxu3 %v1529_v12 }
  0x4d   : > { %612 = vmatpush.bf16.msra.mxu0 %v1594_v14  ;;  %v1574_v14 = vld [vmem:[%s2007_s6 + $0x64] sm:$0xf] }
  0x4e   : > { %701 = vmatpush.bf16.msra.mxu1 %v1602_v15  ;;  %v1350_v15 = vld [vmem:[%s2007_s6 + $0x68] sm:$0xf0] }
  0x4f   : > { %v1353_v17 = vor.u32 %v1574_v14, %v1350_v15 }
  0x50   : > { %613 = vmatmul.bf16.vlgmr.msra.gmra.mxu0 %v1301_v20  ;;  %v1616_v20 = vld [vmem:[#allocation7 + $0x34] sm:$0xf] }
  0x51   : > { %702 = vmatmul.bf16.vlgmr.msra.gmra.mxu1 %v1305_v21  ;;  %v1517_v21 = vor.u32 %v1617_v19, %v1516_v18  ;;  %v1521_v23 = vor.u32 %v1616_v20, %v1518_v22  ;;  %v1582_v18 = vld [vmem:[%s2007_s6 + $0xa4] sm:$0xf]  ;;  %v1382_v19 = vld [vmem:[%s2007_s6 + $0xa8] sm:$0xf0] }
  0x53   : > { %937 = vmatpush.bf16.msra.mxu2 %v1517_v21  ;;  %1026 = vmatpush.bf16.msra.mxu3 %v1521_v23 }
  0x60   : > { %618 = vmatmul.bf16.gmra.mxu0 %v1309_v26  ;;  %v1614_v26 = vld [vmem:[#allocation7 + $0x24] sm:$0xf] }
  0x61   : > { %707 = vmatmul.bf16.gmra.mxu1 %v1313_v27  ;;  %v1509_v27 = vor.u32 %v1615_v25, %v1508_v24  ;;  %v1513_v29 = vor.u32 %v1614_v26, %v1510_v28  ;;  %v1385_v24 = vor.u32 %v1582_v18, %v1382_v19 }
  0x63   : > { %938 = vmatpush.bf16.msra.mxu2 %v1509_v27  ;;  %1027 = vmatpush.bf16.msra.mxu3 %v1513_v29 }
  0x70   : > { %623 = vmatmul.bf16.gmra.mxu0 %v1317_v32  ;;  %v1612_v32 = vld [vmem:[#allocation7 + $0x14] sm:$0xf] }
  0x71   : > { %712 = vmatmul.bf16.gmra.mxu1 %v1321_v33  ;;  %v1501_v33 = vor.u32 %v1613_v31, %v1500_v30  ;;  %v1505_v35 = vor.u32 %v1612_v32, %v1502_v34  ;;  %v1585_v34 = vld [vmem:[%s2007_s6 + $0xb4] sm:$0xf0] }
  0x73   : > { %939 = vmatpush.bf16.msra.mxu2 %v1501_v33  ;;  %1028 = vmatpush.bf16.msra.mxu3 %v1505_v35  ;;  %v1388_v33 = vld [vmem:[%s2007_s6 + $0xb0] sm:$0xf]  ;;  %v1584_v35 = vld [vmem:[%s2007_s6 + $0xb4] sm:$0xf] }
  0x74   : > { %v1393_v41 = vor.u32 %v1584_v35, %v1390_v36 }
  0x80   : > { %628 = vmatmul.bf16.gmra.mxu0 %v1325_v38  ;;  %v1492_v38 = vld [vmem:[#allocation7] sm:$0xf] }
  0x81   : > { %717 = vmatmul.bf16.gmra.mxu1 %v1329_v39  ;;  %v1611_v39 = vld [vmem:[#allocation7 + $0x4] sm:$0xf0] }
  0x82   : > { %v1493_v43 = vor.u32 %v1611_v39, %v1492_v38 }
  0x84   : > { %940 = vmatpush.bf16.msra.mxu2 %v1493_v43 }
  0x90   : > { %633 = vmatmul.bf16.gmra.mxu0 %v1333_v44  ;;  %v1494_v44 = vld [vmem:[#allocation7 + $0x8] sm:$0xf0] }
  0x91   : > { %722 = vmatmul.bf16.gmra.mxu1 %v1337_v45  ;;  %v1497_v45 = vor.u32 %v1610_v40, %v1494_v44  ;;  %v1389_v40 = vor.u32 %v1585_v34, %v1388_v33 }
  0x93   : > { %1029 = vmatpush.bf16.msra.mxu3 %v1497_v45 }
  0xa0   : > { %638 = vmatmul.bf16.gmra.mxu0 %v1341_v56  ;;  %v2056_v56 = vld [vmem:[%s2291_s2] ss:$0 sm:$0xff] }
  0xa1   : > { %727 = vmatmul.bf16.gmra.mxu1 %v1345_v57 }
  0xb0   : > { %643 = vmatmul.bf16.gmra.mxu0 %v1349_v16  ;;  %v1380_v16 = vld [vmem:[%s2007_s6 + $0xa0] sm:$0xf] }
  0xb1   : > { %732 = vmatmul.bf16.gmra.mxu1 %v1353_v17  ;;  %v1583_v17 = vld [vmem:[%s2007_s6 + $0xa4] sm:$0xf0] }
  0xb2   : > { %v1381_v23 = vor.u32 %v1583_v17, %v1380_v16 }
  0xc0   : > { %648 = vmatmul.bf16.gmra.mxu0 %v1357_v46 }
  0xc1   : > { %737 = vmatmul.bf16.gmra.mxu1 %v1361_v47 }
  0xcd   : > { %v614_v54 = vpop.f32.mrf.mxu0 }
  0xce   : > { %v703_v55 = vpop.f32.mrf.mxu1  ;;  %v615_v57 = vadd.f32 %v2056_v56, %v614_v54 }
  0xd0   : > { %653 = vmatmul.bf16.gmra.mxu0 %v1365_v52  ;;  %v704_v60 = vadd.f32 %v703_v55, %v615_v57  ;;  %v1586_v52 = vld [vmem:[%s2007_s6 + $0xc4] sm:$0xf] }
  0xd1   : > { %742 = vmatmul.bf16.gmra.mxu1 %v1369_v53  ;;  %v1398_v53 = vld [vmem:[%s2007_s6 + $0xc8] sm:$0xf0] }
  0xd2   : > { %v783_v3 = vmax.f32 %v704_v60, 0.0 }
  0xd5   : > { %v616_v58 = vpop.f32.mrf.mxu0 }
  0xd6   : > { %v705_v59 = vpop.f32.mrf.mxu1  ;;  %v617_v61 = vadd.f32 %v2056_v56, %v616_v58  ;;  %v1397_v58 = vor.u32 %v1587_v51, %v1396_v50 }
  0xd8   : > { %v706_v62 = vadd.f32 %v705_v59, %v617_v61  ;;  %v1401_v59 = vor.u32 %v1586_v52, %v1398_v53 }
  0xda   : > { %v784_v4 = vmax.f32 %v706_v62, 0.0 }
  0xdc   : > { %v815_v5 = vpack.c.bf16 %v784_v4, %v783_v3  ;;  %v1404_v4 = vld [vmem:[%s2007_s6 + $0xd0] sm:$0xf] }
  0xdd   : > { %v619_v8 = vpop.f32.mrf.mxu0 }
  0xde   : > { %v708_v9 = vpop.f32.mrf.mxu1  ;;  %941 = vmatmul.bf16.vlgmr.msra.gmra.mxu2 %v815_v5  ;;  %1030 = vmatmul.bf16.vlgmr.msra.gmra.mxu3 %v815_v5  ;;  %v620_v10 = vadd.f32 %v2056_v56, %v619_v8  ;;  %v1589_v5 = vld [vmem:[%s2007_s6 + $0xd4] sm:$0xf0] }
  0xe0   : > { %658 = vmatmul.bf16.gmra.mxu0 %v1373_v6  ;;  %v709_v13 = vadd.f32 %v708_v9, %v620_v10  ;;  %v1588_v6 = vld [vmem:[%s2007_s6 + $0xd4] sm:$0xf] }
  0xe1   : > { %747 = vmatmul.bf16.gmra.mxu1 %v1377_v7  ;;  %v1406_v7 = vld [vmem:[%s2007_s6 + $0xd8] sm:$0xf0] }
  0xe2   : > { %v785_v20 = vmax.f32 %v709_v13, 0.0 }
  0xe5   : > { %v621_v11 = vpop.f32.mrf.mxu0 }
  0xe6   : > { %v710_v12 = vpop.f32.mrf.mxu1  ;;  %v622_v14 = vadd.f32 %v2056_v56, %v621_v11  ;;  %v1405_v11 = vor.u32 %v1589_v5, %v1404_v4  ;;  %v847_v5 = vld [vmem:[%s2293_s4] sm:$0x3] }
  0xe8   : > { %v711_v15 = vadd.f32 %v710_v12, %v622_v14  ;;  %v1409_v12 = vor.u32 %v1588_v6, %v1406_v7 }
  0xea   : > { %v786_v21 = vmax.f32 %v711_v15, 0.0 }
  0xec   : > { %v816_v22 = vpack.c.bf16 %v786_v21, %v785_v20  ;;  %v1412_v21 = vld [vmem:[%s2007_s6 + $0xe0] sm:$0xf] }
  0xed   : > { %v624_v25 = vpop.f32.mrf.mxu0 }
  0xee   : > { %v713_v26 = vpop.f32.mrf.mxu1  ;;  %946 = vmatmul.bf16.gmra.mxu2 %v816_v22  ;;  %1035 = vmatmul.bf16.gmra.mxu3 %v816_v22  ;;  %v625_v27 = vadd.f32 %v2056_v56, %v624_v25  ;;  %v1591_v22 = vld [vmem:[%s2007_s6 + $0xe4] sm:$0xf0] }
  0xf0   : > { %663 = vmatmul.bf16.gmra.mxu0 %v1381_v23  ;;  %v714_v30 = vadd.f32 %v713_v26, %v625_v27  ;;  %v1590_v23 = vld [vmem:[%s2007_s6 + $0xe4] sm:$0xf] }
  0xf1   : > { %752 = vmatmul.bf16.gmra.mxu1 %v1385_v24  ;;  %v1414_v24 = vld [vmem:[%s2007_s6 + $0xe8] sm:$0xf0] }
  0xf2   : > { %v787_v37 = vmax.f32 %v714_v30, 0.0 }
  0xf5   : > { %v626_v28 = vpop.f32.mrf.mxu0 }
  0xf6   : > { %v715_v29 = vpop.f32.mrf.mxu1  ;;  %v627_v31 = vadd.f32 %v2056_v56, %v626_v28  ;;  %v1413_v28 = vor.u32 %v1591_v22, %v1412_v21 }
  0xf8   : > { %v716_v32 = vadd.f32 %v715_v29, %v627_v31  ;;  %v1417_v29 = vor.u32 %v1590_v23, %v1414_v24 }
  0xfa   : > { %v788_v38 = vmax.f32 %v716_v32, 0.0 }
  0xfc   : > { %v817_v39 = vpack.c.bf16 %v788_v38, %v787_v37  ;;  %v1420_v38 = vld [vmem:[%s2007_s6 + $0xf0] sm:$0xf] }
  0xfd   : > { %v629_v42 = vpop.f32.mrf.mxu0 }
  0xfe   : > { %v718_v43 = vpop.f32.mrf.mxu1  ;;  %951 = vmatmul.bf16.gmra.mxu2 %v817_v39  ;;  %1040 = vmatmul.bf16.gmra.mxu3 %v817_v39  ;;  %v630_v44 = vadd.f32 %v2056_v56, %v629_v42  ;;  %v1593_v39 = vld [vmem:[%s2007_s6 + $0xf4] sm:$0xf0] }
 0x100   : > { %668 = vmatmul.bf16.gmra.mxu0 %v1389_v40  ;;  %v719_v47 = vadd.f32 %v718_v43, %v630_v44  ;;  %v1592_v40 = vld [vmem:[%s2007_s6 + $0xf4] sm:$0xf] }
 0x101   : > { %757 = vmatmul.bf16.gmra.mxu1 %v1393_v41  ;;  %v1422_v41 = vld [vmem:[%s2007_s6 + $0xf8] sm:$0xf0] }
 0x102   : > { %v789_v54 = vmax.f32 %v719_v47, 0.0 }
 0x105   : > { %v631_v45 = vpop.f32.mrf.mxu0 }
 0x106   : > { %v720_v46 = vpop.f32.mrf.mxu1  ;;  %v632_v48 = vadd.f32 %v2056_v56, %v631_v45  ;;  %v1421_v45 = vor.u32 %v1593_v39, %v1420_v38 }
 0x108   : > { %v721_v49 = vadd.f32 %v720_v46, %v632_v48  ;;  %v1425_v46 = vor.u32 %v1592_v40, %v1422_v41 }
 0x10a   : > { %v790_v55 = vmax.f32 %v721_v49, 0.0 }
 0x10c   : > { %v818_v57 = vpack.c.bf16 %v790_v55, %v789_v54 }
 0x10d   : > { %v634_v60 = vpop.f32.mrf.mxu0 }
 0x10e   : > { %v723_v61 = vpop.f32.mrf.mxu1  ;;  %956 = vmatmul.bf16.gmra.mxu2 %v818_v57  ;;  %1045 = vmatmul.bf16.gmra.mxu3 %v818_v57  ;;  %v635_v62 = vadd.f32 %v2056_v56, %v634_v60 }
 0x110   : > { %673 = vmatmul.bf16.gmra.mxu0 %v1397_v58  ;;  %v724_v1 = vadd.f32 %v723_v61, %v635_v62 }
 0x111   : > { %762 = vmatmul.bf16.gmra.mxu1 %v1401_v59 }
 0x112   : > { %v791_v8 = vmax.f32 %v724_v1, 0.0 }
 0x115   : > { %v636_v63 = vpop.f32.mrf.mxu0 }
 0x116   : > { %v725_v0 = vpop.f32.mrf.mxu1  ;;  %v637_v2 = vadd.f32 %v2056_v56, %v636_v63 }
 0x118   : > { %v726_v3 = vadd.f32 %v725_v0, %v637_v2 }
 0x11a   : > { %v792_v9 = vmax.f32 %v726_v3, 0.0 }
 0x11c   : > { %v819_v10 = vpack.c.bf16 %v792_v9, %v791_v8  ;;  %v2108_v9 = vperm.slane %v847_v5, 0 }
 0x11d   : > { %v639_v13 = vpop.f32.mrf.mxu0 }
 0x11e   : > { %v728_v14 = vpop.f32.mrf.mxu1  ;;  %961 = vmatmul.bf16.gmra.mxu2 %v819_v10  ;;  %1050 = vmatmul.bf16.gmra.mxu3 %v819_v10  ;;  %v640_v15 = vadd.f32 %v2056_v56, %v639_v13  ;;  %v2110_v10 = vperm.slane %v847_v5, 1 }
 0x120   : > { %678 = vmatmul.bf16.gmra.mxu0 %v1405_v11  ;;  %v729_v18 = vadd.f32 %v728_v14, %v640_v15 }
 0x121   : > { %767 = vmatmul.bf16.gmra.mxu1 %v1409_v12 }
 0x122   : > { %v793_v25 = vmax.f32 %v729_v18, 0.0 }
 0x125   : > { %v641_v16 = vpop.f32.mrf.mxu0 }
 0x126   : > { %v730_v17 = vpop.f32.mrf.mxu1  ;;  %v642_v19 = vadd.f32 %v2056_v56, %v641_v16 }
 0x128   : > { %v731_v20 = vadd.f32 %v730_v17, %v642_v19 }
 0x12a   : > { %v794_v26 = vmax.f32 %v731_v20, 0.0 }
 0x12c   : > { %v820_v27 = vpack.c.bf16 %v794_v26, %v793_v25 }
 0x12d   : > { %v644_v30 = vpop.f32.mrf.mxu0 }
 0x12e   : > { %v733_v31 = vpop.f32.mrf.mxu1  ;;  %966 = vmatmul.bf16.gmra.mxu2 %v820_v27  ;;  %1055 = vmatmul.bf16.gmra.mxu3 %v820_v27  ;;  %v645_v32 = vadd.f32 %v2056_v56, %v644_v30 }
 0x130   : > { %683 = vmatmul.bf16.gmra.mxu0 %v1413_v28  ;;  %v734_v35 = vadd.f32 %v733_v31, %v645_v32 }
 0x131   : > { %772 = vmatmul.bf16.gmra.mxu1 %v1417_v29 }
 0x132   : > { %v795_v42 = vmax.f32 %v734_v35, 0.0 }
 0x135   : > { %v646_v33 = vpop.f32.mrf.mxu0 }
 0x136   : > { %v735_v34 = vpop.f32.mrf.mxu1  ;;  %v647_v36 = vadd.f32 %v2056_v56, %v646_v33 }
 0x138   : > { %v736_v37 = vadd.f32 %v735_v34, %v647_v36 }
 0x13a   : > { %v796_v43 = vmax.f32 %v736_v37, 0.0 }
 0x13c   : > { %v821_v44 = vpack.c.bf16 %v796_v43, %v795_v42 }
 0x13d   : > { %v649_v47 = vpop.f32.mrf.mxu0 }
 0x13e   : > { %v738_v48 = vpop.f32.mrf.mxu1  ;;  %971 = vmatmul.bf16.gmra.mxu2 %v821_v44  ;;  %1060 = vmatmul.bf16.gmra.mxu3 %v821_v44  ;;  %v650_v49 = vadd.f32 %v2056_v56, %v649_v47 }
 0x140   : > { %688 = vmatmul.bf16.gmra.mxu0 %v1421_v45  ;;  %v739_v52 = vadd.f32 %v738_v48, %v650_v49 }
 0x141   : > { %777 = vmatmul.bf16.gmra.mxu1 %v1425_v46 }
 0x142   : > { %v797_v55 = vmax.f32 %v739_v52, 0.0 }
 0x145   : > { %v651_v50 = vpop.f32.mrf.mxu0 }
 0x146   : > { %v740_v51 = vpop.f32.mrf.mxu1  ;;  %v652_v53 = vadd.f32 %v2056_v56, %v651_v50 }
 0x148   : > { %v741_v54 = vadd.f32 %v740_v51, %v652_v53 }
 0x14a   : > { %v798_v57 = vmax.f32 %v741_v54, 0.0 }
 0x14c   : > { %v822_v58 = vpack.c.bf16 %v798_v57, %v797_v55 }
 0x14d   : > { %v654_v59 = vpop.f32.mrf.mxu0 }
 0x14e   : > { %v743_v60 = vpop.f32.mrf.mxu1  ;;  %976 = vmatmul.bf16.gmra.mxu2 %v822_v58  ;;  %1065 = vmatmul.bf16.gmra.mxu3 %v822_v58  ;;  %v655_v61 = vadd.f32 %v2056_v56, %v654_v59 }
 0x150   : > { %v744_v0 = vadd.f32 %v743_v60, %v655_v61 }
 0x152   : > { %v799_v3 = vmax.f32 %v744_v0, 0.0 }
 0x155   : > { %v656_v62 = vpop.f32.mrf.mxu0 }
 0x156   : > { %v745_v63 = vpop.f32.mrf.mxu1  ;;  %v657_v1 = vadd.f32 %v2056_v56, %v656_v62 }
 0x158   : > { %v746_v2 = vadd.f32 %v745_v63, %v657_v1 }
 0x15a   : > { %v800_v4 = vmax.f32 %v746_v2, 0.0 }
 0x15c   : > { %v823_v6 = vpack.c.bf16 %v800_v4, %v799_v3 }
 0x15d   : > { %v659_v7 = vpop.f32.mrf.mxu0 }
 0x15e   : > { %v748_v8 = vpop.f32.mrf.mxu1  ;;  %981 = vmatmul.bf16.gmra.mxu2 %v823_v6  ;;  %1070 = vmatmul.bf16.gmra.mxu3 %v823_v6  ;;  %v660_v13 = vadd.f32 %v2056_v56, %v659_v7 }
 0x160   : > { %v749_v18 = vadd.f32 %v748_v8, %v660_v13 }
 0x161   : > { %v942_v11 = vpop.f32.mrf.mxu2  ;;  %v1031_v12 = vpop.f32.mrf.mxu3 }
 0x162   : > { %v943_v14 = vadd.f32 %v942_v11, %v2108_v9  ;;  %v1032_v15 = vadd.f32 %v1031_v12, %v2110_v10  ;;  %v801_v23 = vmax.f32 %v749_v18, 0.0 }
 0x164   : > { %1111 = vst [vmem:[%s2115_s13] sm:$0xff] %v943_v14 }
 0x165   : > { %1112 = vst [vmem:[%s2115_s13 + $0x8] sm:$0xff] %v1032_v15  ;;  %v661_v16 = vpop.f32.mrf.mxu0 }
 0x166   : > { %v750_v17 = vpop.f32.mrf.mxu1  ;;  %v662_v19 = vadd.f32 %v2056_v56, %v661_v16 }
 0x168   : > { %v751_v20 = vadd.f32 %v750_v17, %v662_v19 }
 0x169   : > { %v944_v21 = vpop.f32.mrf.mxu2  ;;  %v1033_v22 = vpop.f32.mrf.mxu3 }
 0x16a   : > { %v802_v24 = vmax.f32 %v751_v20, 0.0  ;;  %v945_v25 = vadd.f32 %v944_v21, %v2108_v9  ;;  %v1034_v26 = vadd.f32 %v1033_v22, %v2110_v10 }
 0x16c   : > { %1113 = vst [vmem:[%s2115_s13 + $0x10] sm:$0xff] %v945_v25  ;;  %v824_v27 = vpack.c.bf16 %v802_v24, %v801_v23 }
 0x16d   : > { %1114 = vst [vmem:[%s2115_s13 + $0x18] sm:$0xff] %v1034_v26  ;;  %v664_v28 = vpop.f32.mrf.mxu0 }
 0x16e   : > { %v753_v29 = vpop.f32.mrf.mxu1  ;;  %986 = vmatmul.bf16.gmra.mxu2 %v824_v27  ;;  %1075 = vmatmul.bf16.gmra.mxu3 %v824_v27  ;;  %v665_v32 = vadd.f32 %v2056_v56, %v664_v28 }
 0x170   : > { %v754_v37 = vadd.f32 %v753_v29, %v665_v32 }
 0x171   : > { %v947_v30 = vpop.f32.mrf.mxu2  ;;  %v1036_v31 = vpop.f32.mrf.mxu3 }
 0x172   : > { %v948_v33 = vadd.f32 %v947_v30, %v2108_v9  ;;  %v1037_v34 = vadd.f32 %v1036_v31, %v2110_v10  ;;  %v803_v42 = vmax.f32 %v754_v37, 0.0 }
 0x174   : > { %1115 = vst [vmem:[%s2115_s13 + $0x20] sm:$0xff] %v948_v33 }
 0x175   : > { %1116 = vst [vmem:[%s2115_s13 + $0x28] sm:$0xff] %v1037_v34  ;;  %v666_v35 = vpop.f32.mrf.mxu0 }
 0x176   : > { %v755_v36 = vpop.f32.mrf.mxu1  ;;  %v667_v38 = vadd.f32 %v2056_v56, %v666_v35 }
 0x178   : > { %v756_v39 = vadd.f32 %v755_v36, %v667_v38 }
 0x179   : > { %v949_v40 = vpop.f32.mrf.mxu2  ;;  %v1038_v41 = vpop.f32.mrf.mxu3 }
 0x17a   : > { %v804_v43 = vmax.f32 %v756_v39, 0.0  ;;  %v950_v44 = vadd.f32 %v949_v40, %v2108_v9  ;;  %v1039_v45 = vadd.f32 %v1038_v41, %v2110_v10 }
 0x17c   : > { %1117 = vst [vmem:[%s2115_s13 + $0x30] sm:$0xff] %v950_v44  ;;  %v825_v46 = vpack.c.bf16 %v804_v43, %v803_v42 }
 0x17d   : > { %1118 = vst [vmem:[%s2115_s13 + $0x38] sm:$0xff] %v1039_v45  ;;  %v669_v47 = vpop.f32.mrf.mxu0 }
 0x17e   : > { %v758_v48 = vpop.f32.mrf.mxu1  ;;  %991 = vmatmul.bf16.gmra.mxu2 %v825_v46  ;;  %1080 = vmatmul.bf16.gmra.mxu3 %v825_v46  ;;  %v670_v51 = vadd.f32 %v2056_v56, %v669_v47 }
 0x180   : > { %v759_v57 = vadd.f32 %v758_v48, %v670_v51 }
 0x181   : > { %v952_v49 = vpop.f32.mrf.mxu2  ;;  %v1041_v50 = vpop.f32.mrf.mxu3 }
 0x182   : > { %v953_v52 = vadd.f32 %v952_v49, %v2108_v9  ;;  %v1042_v53 = vadd.f32 %v1041_v50, %v2110_v10  ;;  %v805_v62 = vmax.f32 %v759_v57, 0.0 }
 0x184   : > { %1119 = vst [vmem:[%s2115_s13 + $0x40] sm:$0xff] %v953_v52 }
 0x185   : > { %1120 = vst [vmem:[%s2115_s13 + $0x48] sm:$0xff] %v1042_v53  ;;  %v671_v54 = vpop.f32.mrf.mxu0 }
 0x186   : > { %v760_v55 = vpop.f32.mrf.mxu1  ;;  %v672_v58 = vadd.f32 %v2056_v56, %v671_v54 }
 0x188   : > { %v761_v59 = vadd.f32 %v760_v55, %v672_v58 }
 0x189   : > { %v954_v60 = vpop.f32.mrf.mxu2  ;;  %v1043_v61 = vpop.f32.mrf.mxu3 }
 0x18a   : > { %v806_v63 = vmax.f32 %v761_v59, 0.0  ;;  %v955_v0 = vadd.f32 %v954_v60, %v2108_v9  ;;  %v1044_v1 = vadd.f32 %v1043_v61, %v2110_v10 }
 0x18c   : > { %1121 = vst [vmem:[%s2115_s13 + $0x50] sm:$0xff] %v955_v0  ;;  %v826_v2 = vpack.c.bf16 %v806_v63, %v805_v62 }
 0x18d   : > { %1122 = vst [vmem:[%s2115_s13 + $0x58] sm:$0xff] %v1044_v1  ;;  %v674_v3 = vpop.f32.mrf.mxu0 }
 0x18e   : > { %v763_v4 = vpop.f32.mrf.mxu1  ;;  %996 = vmatmul.bf16.gmra.mxu2 %v826_v2  ;;  %1085 = vmatmul.bf16.gmra.mxu3 %v826_v2  ;;  %v675_v7 = vadd.f32 %v2056_v56, %v674_v3 }
 0x190   : > { %v764_v14 = vadd.f32 %v763_v4, %v675_v7 }
 0x191   : > { %v957_v5 = vpop.f32.mrf.mxu2  ;;  %v1046_v6 = vpop.f32.mrf.mxu3 }
 0x192   : > { %v958_v8 = vadd.f32 %v957_v5, %v2108_v9  ;;  %v1047_v11 = vadd.f32 %v1046_v6, %v2110_v10  ;;  %v807_v19 = vmax.f32 %v764_v14, 0.0 }
 0x194   : > { %1123 = vst [vmem:[%s2115_s13 + $0x60] sm:$0xff] %v958_v8 }
 0x195   : > { %1124 = vst [vmem:[%s2115_s13 + $0x68] sm:$0xff] %v1047_v11  ;;  %v676_v12 = vpop.f32.mrf.mxu0 }
 0x196   : > { %v765_v13 = vpop.f32.mrf.mxu1  ;;  %v677_v15 = vadd.f32 %v2056_v56, %v676_v12 }
 0x198   : > { %v766_v16 = vadd.f32 %v765_v13, %v677_v15 }
 0x199   : > { %v959_v17 = vpop.f32.mrf.mxu2  ;;  %v1048_v18 = vpop.f32.mrf.mxu3 }
 0x19a   : > { %v808_v20 = vmax.f32 %v766_v16, 0.0  ;;  %v960_v21 = vadd.f32 %v959_v17, %v2108_v9  ;;  %v1049_v22 = vadd.f32 %v1048_v18, %v2110_v10 }
 0x19c   : > { %v827_v23 = vpack.c.bf16 %v808_v20, %v807_v19  ;;  %1125 = vst [vmem:[%s2115_s13 + $0x70] sm:$0xff] %v960_v21 }
 0x19d   : > { %1126 = vst [vmem:[%s2115_s13 + $0x78] sm:$0xff] %v1049_v22  ;;  %v679_v24 = vpop.f32.mrf.mxu0 }
 0x19e   : > { %v768_v25 = vpop.f32.mrf.mxu1  ;;  %1001 = vmatmul.bf16.gmra.mxu2 %v827_v23  ;;  %1090 = vmatmul.bf16.gmra.mxu3 %v827_v23  ;;  %v680_v28 = vadd.f32 %v2056_v56, %v679_v24 }
 0x1a0   : > { %v769_v33 = vadd.f32 %v768_v25, %v680_v28 }
 0x1a1   : > { %v962_v26 = vpop.f32.mrf.mxu2  ;;  %v1051_v27 = vpop.f32.mrf.mxu3 }
 0x1a2   : > { %v963_v29 = vadd.f32 %v962_v26, %v2108_v9  ;;  %v1052_v30 = vadd.f32 %v1051_v27, %v2110_v10  ;;  %v809_v38 = vmax.f32 %v769_v33, 0.0 }
 0x1a4   : > { %1127 = vst [vmem:[%s2115_s13 + $0x80] sm:$0xff] %v963_v29 }
 0x1a5   : > { %1128 = vst [vmem:[%s2115_s13 + $0x88] sm:$0xff] %v1052_v30  ;;  %v681_v31 = vpop.f32.mrf.mxu0 }
 0x1a6   : > { %v770_v32 = vpop.f32.mrf.mxu1  ;;  %v682_v34 = vadd.f32 %v2056_v56, %v681_v31 }
 0x1a8   : > { %v771_v35 = vadd.f32 %v770_v32, %v682_v34 }
 0x1a9   : > { %v964_v36 = vpop.f32.mrf.mxu2  ;;  %v1053_v37 = vpop.f32.mrf.mxu3 }
 0x1aa   : > { %v810_v39 = vmax.f32 %v771_v35, 0.0  ;;  %v965_v40 = vadd.f32 %v964_v36, %v2108_v9  ;;  %v1054_v41 = vadd.f32 %v1053_v37, %v2110_v10 }
 0x1ac   : > { %v828_v42 = vpack.c.bf16 %v810_v39, %v809_v38  ;;  %1129 = vst [vmem:[%s2115_s13 + $0x90] sm:$0xff] %v965_v40 }
 0x1ad   : > { %1130 = vst [vmem:[%s2115_s13 + $0x98] sm:$0xff] %v1054_v41  ;;  %v684_v43 = vpop.f32.mrf.mxu0 }
 0x1ae   : > { %v773_v44 = vpop.f32.mrf.mxu1  ;;  %1006 = vmatmul.bf16.gmra.mxu2 %v828_v42  ;;  %1095 = vmatmul.bf16.gmra.mxu3 %v828_v42  ;;  %v685_v47 = vadd.f32 %v2056_v56, %v684_v43 }
 0x1b0   : > { %v774_v52 = vadd.f32 %v773_v44, %v685_v47 }
 0x1b1   : > { %v967_v45 = vpop.f32.mrf.mxu2  ;;  %v1056_v46 = vpop.f32.mrf.mxu3 }
 0x1b2   : > { %v968_v48 = vadd.f32 %v967_v45, %v2108_v9  ;;  %v1057_v49 = vadd.f32 %v1056_v46, %v2110_v10  ;;  %v811_v58 = vmax.f32 %v774_v52, 0.0 }
 0x1b4   : > { %1131 = vst [vmem:[%s2115_s13 + $0xa0] sm:$0xff] %v968_v48 }
 0x1b5   : > { %1132 = vst [vmem:[%s2115_s13 + $0xa8] sm:$0xff] %v1057_v49  ;;  %v686_v50 = vpop.f32.mrf.mxu0 }
 0x1b6   : > { %v775_v51 = vpop.f32.mrf.mxu1  ;;  %v687_v53 = vadd.f32 %v2056_v56, %v686_v50 }
 0x1b8   : > { %v776_v54 = vadd.f32 %v775_v51, %v687_v53 }
 0x1b9   : > { %v969_v55 = vpop.f32.mrf.mxu2  ;;  %v1058_v57 = vpop.f32.mrf.mxu3 }
 0x1ba   : > { %v812_v59 = vmax.f32 %v776_v54, 0.0  ;;  %v970_v60 = vadd.f32 %v969_v55, %v2108_v9  ;;  %v1059_v61 = vadd.f32 %v1058_v57, %v2110_v10 }
 0x1bc   : > { %v829_v62 = vpack.c.bf16 %v812_v59, %v811_v58  ;;  %1133 = vst [vmem:[%s2115_s13 + $0xb0] sm:$0xff] %v970_v60 }
 0x1bd   : > { %1134 = vst [vmem:[%s2115_s13 + $0xb8] sm:$0xff] %v1059_v61  ;;  %v689_v63 = vpop.f32.mrf.mxu0 }
 0x1be   : > { %v778_v0 = vpop.f32.mrf.mxu1  ;;  %1011 = vmatmul.bf16.gmra.mxu2 %v829_v62  ;;  %1100 = vmatmul.bf16.gmra.mxu3 %v829_v62  ;;  %v690_v3 = vadd.f32 %v2056_v56, %v689_v63 }
 0x1c0   : > { %v779_v7 = vadd.f32 %v778_v0, %v690_v3 }
 0x1c1   : > { %v972_v1 = vpop.f32.mrf.mxu2  ;;  %v1061_v2 = vpop.f32.mrf.mxu3 }
 0x1c2   : > { %v973_v4 = vadd.f32 %v972_v1, %v2108_v9  ;;  %v1062_v5 = vadd.f32 %v1061_v2, %v2110_v10  ;;  %v813_v15 = vmax.f32 %v779_v7, 0.0 }
 0x1c4   : > { %1135 = vst [vmem:[%s2115_s13 + $0xc0] sm:$0xff] %v973_v4 }
 0x1c5   : > { %1136 = vst [vmem:[%s2115_s13 + $0xc8] sm:$0xff] %v1062_v5  ;;  %v691_v6 = vpop.f32.mrf.mxu0 }
 0x1c6   : > { %v692_v8 = vadd.f32 %v2056_v56, %v691_v6  ;;  %v780_v11 = vpop.f32.mrf.mxu1 }
 0x1c8   : > { %v781_v12 = vadd.f32 %v780_v11, %v692_v8 }
 0x1c9   : > { %v974_v13 = vpop.f32.mrf.mxu2  ;;  %v1063_v14 = vpop.f32.mrf.mxu3 }
 0x1ca   : > { %v814_v16 = vmax.f32 %v781_v12, 0.0  ;;  %v975_v17 = vadd.f32 %v974_v13, %v2108_v9  ;;  %v1064_v18 = vadd.f32 %v1063_v14, %v2110_v10 }
 0x1cc   : > { %v830_v19 = vpack.c.bf16 %v814_v16, %v813_v15  ;;  %1137 = vst [vmem:[%s2115_s13 + $0xd0] sm:$0xff] %v975_v17 }
 0x1cd   : > { %1138 = vst [vmem:[%s2115_s13 + $0xd8] sm:$0xff] %v1064_v18 }
 0x1ce   : > { %1016 = vmatmul.bf16.gmra.mxu2 %v830_v19  ;;  %1105 = vmatmul.bf16.gmra.mxu3 %v830_v19 }
 0x1d1   : > { %v977_v56 = vpop.f32.mrf.mxu2  ;;  %v1066_v20 = vpop.f32.mrf.mxu3 }
 0x1d2   : > { %v978_v21 = vadd.f32 %v977_v56, %v2108_v9  ;;  %v1067_v22 = vadd.f32 %v1066_v20, %v2110_v10 }
 0x1d4   : > { %1139 = vst [vmem:[%s2115_s13 + $0xe0] sm:$0xff] %v978_v21 }
 0x1d5   : > { %1140 = vst [vmem:[%s2115_s13 + $0xe8] sm:$0xff] %v1067_v22 }
 0x1d9   : > { %v979_v23 = vpop.f32.mrf.mxu2  ;;  %v1068_v24 = vpop.f32.mrf.mxu3 }
 0x1da   : > { %v980_v25 = vadd.f32 %v979_v23, %v2108_v9  ;;  %v1069_v26 = vadd.f32 %v1068_v24, %v2110_v10 }
 0x1dc   : > { %1141 = vst [vmem:[%s2115_s13 + $0xf0] sm:$0xff] %v980_v25 }
 0x1dd   : > { %1142 = vst [vmem:[%s2115_s13 + $0xf8] sm:$0xff] %v1069_v26 }
 0x1e1   : > { %v982_v27 = vpop.f32.mrf.mxu2  ;;  %v1071_v28 = vpop.f32.mrf.mxu3 }
 0x1e2   : > { %v983_v29 = vadd.f32 %v982_v27, %v2108_v9  ;;  %v1072_v30 = vadd.f32 %v1071_v28, %v2110_v10 }
 0x1e4   : > { %1143 = vst [vmem:[%s2115_s13 + $0x100] sm:$0xff] %v983_v29 }
 0x1e5   : > { %1144 = vst [vmem:[%s2115_s13 + $0x108] sm:$0xff] %v1072_v30 }
 0x1e9   : > { %v984_v31 = vpop.f32.mrf.mxu2  ;;  %v1073_v32 = vpop.f32.mrf.mxu3 }
 0x1ea   : > { %v985_v33 = vadd.f32 %v984_v31, %v2108_v9  ;;  %v1074_v34 = vadd.f32 %v1073_v32, %v2110_v10 }
 0x1ec   : > { %1145 = vst [vmem:[%s2115_s13 + $0x110] sm:$0xff] %v985_v33 }
 0x1ed   : > { %1146 = vst [vmem:[%s2115_s13 + $0x118] sm:$0xff] %v1074_v34 }
 0x1f1   : > { %v987_v35 = vpop.f32.mrf.mxu2  ;;  %v1076_v36 = vpop.f32.mrf.mxu3 }
 0x1f2   : > { %v988_v37 = vadd.f32 %v987_v35, %v2108_v9  ;;  %v1077_v38 = vadd.f32 %v1076_v36, %v2110_v10 }
 0x1f4   : > { %1147 = vst [vmem:[%s2115_s13 + $0x120] sm:$0xff] %v988_v37 }
 0x1f5   : > { %1148 = vst [vmem:[%s2115_s13 + $0x128] sm:$0xff] %v1077_v38 }
 0x1f9   : > { %v989_v39 = vpop.f32.mrf.mxu2  ;;  %v1078_v40 = vpop.f32.mrf.mxu3 }
 0x1fa   : > { %v990_v41 = vadd.f32 %v989_v39, %v2108_v9  ;;  %v1079_v42 = vadd.f32 %v1078_v40, %v2110_v10 }
 0x1fc   : > { %1149 = vst [vmem:[%s2115_s13 + $0x130] sm:$0xff] %v990_v41 }
 0x1fd   : > { %1150 = vst [vmem:[%s2115_s13 + $0x138] sm:$0xff] %v1079_v42 }
 0x201   : > { %v992_v43 = vpop.f32.mrf.mxu2  ;;  %v1081_v44 = vpop.f32.mrf.mxu3 }
 0x202   : > { %v993_v45 = vadd.f32 %v992_v43, %v2108_v9  ;;  %v1082_v46 = vadd.f32 %v1081_v44, %v2110_v10 }
 0x204   : > { %1151 = vst [vmem:[%s2115_s13 + $0x140] sm:$0xff] %v993_v45 }
 0x205   : > { %1152 = vst [vmem:[%s2115_s13 + $0x148] sm:$0xff] %v1082_v46 }
 0x209   : > { %v994_v47 = vpop.f32.mrf.mxu2  ;;  %v1083_v48 = vpop.f32.mrf.mxu3 }
 0x20a   : > { %v995_v49 = vadd.f32 %v994_v47, %v2108_v9  ;;  %v1084_v50 = vadd.f32 %v1083_v48, %v2110_v10 }
 0x20c   : > { %1153 = vst [vmem:[%s2115_s13 + $0x150] sm:$0xff] %v995_v49 }
 0x20d   : > { %1154 = vst [vmem:[%s2115_s13 + $0x158] sm:$0xff] %v1084_v50 }
 0x211   : > { %v997_v51 = vpop.f32.mrf.mxu2  ;;  %v1086_v52 = vpop.f32.mrf.mxu3 }
 0x212   : > { %v998_v53 = vadd.f32 %v997_v51, %v2108_v9  ;;  %v1087_v54 = vadd.f32 %v1086_v52, %v2110_v10 }
 0x214   : > { %1155 = vst [vmem:[%s2115_s13 + $0x160] sm:$0xff] %v998_v53 }
 0x215   : > { %1156 = vst [vmem:[%s2115_s13 + $0x168] sm:$0xff] %v1087_v54 }
 0x219   : > { %v999_v55 = vpop.f32.mrf.mxu2  ;;  %v1088_v57 = vpop.f32.mrf.mxu3 }
 0x21a   : > { %v1000_v58 = vadd.f32 %v999_v55, %v2108_v9  ;;  %v1089_v59 = vadd.f32 %v1088_v57, %v2110_v10 }
 0x21c   : > { %1157 = vst [vmem:[%s2115_s13 + $0x170] sm:$0xff] %v1000_v58 }
 0x21d   : > { %1158 = vst [vmem:[%s2115_s13 + $0x178] sm:$0xff] %v1089_v59 }
 0x221   : > { %v1002_v60 = vpop.f32.mrf.mxu2  ;;  %v1091_v61 = vpop.f32.mrf.mxu3 }
 0x222   : > { %v1003_v62 = vadd.f32 %v1002_v60, %v2108_v9  ;;  %v1092_v63 = vadd.f32 %v1091_v61, %v2110_v10 }
 0x224   : > { %1159 = vst [vmem:[%s2115_s13 + $0x180] sm:$0xff] %v1003_v62 }
 0x225   : > { %1160 = vst [vmem:[%s2115_s13 + $0x188] sm:$0xff] %v1092_v63 }
 0x229   : > { %v1004_v0 = vpop.f32.mrf.mxu2  ;;  %v1093_v1 = vpop.f32.mrf.mxu3 }
 0x22a   : > { %v1005_v2 = vadd.f32 %v1004_v0, %v2108_v9  ;;  %v1094_v3 = vadd.f32 %v1093_v1, %v2110_v10 }
 0x22c   : > { %1161 = vst [vmem:[%s2115_s13 + $0x190] sm:$0xff] %v1005_v2 }
 0x22d   : > { %1162 = vst [vmem:[%s2115_s13 + $0x198] sm:$0xff] %v1094_v3 }
 0x231   : > { %v1007_v4 = vpop.f32.mrf.mxu2  ;;  %v1096_v5 = vpop.f32.mrf.mxu3 }
 0x232   : > { %v1008_v6 = vadd.f32 %v1007_v4, %v2108_v9  ;;  %v1097_v7 = vadd.f32 %v1096_v5, %v2110_v10 }
 0x234   : > { %1163 = vst [vmem:[%s2115_s13 + $0x1a0] sm:$0xff] %v1008_v6 }
 0x235   : > { %1164 = vst [vmem:[%s2115_s13 + $0x1a8] sm:$0xff] %v1097_v7 }
 0x239   : > { %v1009_v8 = vpop.f32.mrf.mxu2  ;;  %v1098_v11 = vpop.f32.mrf.mxu3 }
 0x23a   : > { %v1010_v12 = vadd.f32 %v1009_v8, %v2108_v9  ;;  %v1099_v13 = vadd.f32 %v1098_v11, %v2110_v10 }
 0x23c   : > { %1165 = vst [vmem:[%s2115_s13 + $0x1b0] sm:$0xff] %v1010_v12 }
 0x23d   : > { %1166 = vst [vmem:[%s2115_s13 + $0x1b8] sm:$0xff] %v1099_v13 }
 0x241   : > { %v1012_v14 = vpop.f32.mrf.mxu2  ;;  %v1101_v15 = vpop.f32.mrf.mxu3 }
 0x242   : > { %v1013_v16 = vadd.f32 %v1012_v14, %v2108_v9  ;;  %v1102_v17 = vadd.f32 %v1101_v15, %v2110_v10 }
 0x244   : > { %1167 = vst [vmem:[%s2115_s13 + $0x1c0] sm:$0xff] %v1013_v16 }
 0x245   : > { %1168 = vst [vmem:[%s2115_s13 + $0x1c8] sm:$0xff] %v1102_v17 }
 0x249   : > { %v1014_v18 = vpop.f32.mrf.mxu2  ;;  %v1103_v19 = vpop.f32.mrf.mxu3 }
 0x24a   : > { %v1015_v56 = vadd.f32 %v1014_v18, %v2108_v9  ;;  %v1104_v20 = vadd.f32 %v1103_v19, %v2110_v10 }
 0x24c   : > { %1169 = vst [vmem:[%s2115_s13 + $0x1d0] sm:$0xff] %v1015_v56 }
 0x24d   : > { %1170 = vst [vmem:[%s2115_s13 + $0x1d8] sm:$0xff] %v1104_v20 }
 0x251   : > { %v1017_v21 = vpop.f32.mrf.mxu2  ;;  %v1106_v22 = vpop.f32.mrf.mxu3 }
 0x252   : > { %v1018_v23 = vadd.f32 %v1017_v21, %v2108_v9  ;;  %v1107_v24 = vadd.f32 %v1106_v22, %v2110_v10 }
 0x254   : > { %1171 = vst [vmem:[%s2115_s13 + $0x1e0] sm:$0xff] %v1018_v23 }
 0x255   : > { %1172 = vst [vmem:[%s2115_s13 + $0x1e8] sm:$0xff] %v1107_v24 }
 0x259   : > { %v1019_v25 = vpop.f32.mrf.mxu2  ;;  %v1108_v26 = vpop.f32.mrf.mxu3 }
 0x25a   : > { %v1020_v27 = vadd.f32 %v1019_v25, %v2108_v9  ;;  %v1109_v28 = vadd.f32 %v1108_v26, %v2110_v10 }
 0x25c   : > { %1173 = vst [vmem:[%s2115_s13 + $0x1f0] sm:$0xff] %v1020_v27 }
 0x25d   : > { %1174 = vst [vmem:[%s2115_s13 + $0x1f8] sm:$0xff] %v1109_v28 }
 0x25e   : > { %1819 = shalt.err (!%p1816_p10)
}
 0x25f   : > { %s1870_s10 = smov 256   ;;  %s1871_s12 = smov 16  }
 0x260   : > { %1638 = dma.vmem_to_hbm [thread:$0]  (%p1973_p3), %s1190_s9, 8192, %s1192_s28, %s1176_s22, %s1870_s10, %s1870_s10, %s1871_s12  }
 0x261 PF: > { %p1660_p11 = scmp.ge.s32.totalorder %s1862_s21, 2  ;;  %s1206_s13 = sand.u32 1, %s1850_s18  }
 0x262   : > { %s1207_s17 = scalar_lea.sflag [#allocation4], %s1206_s13 }
 0x263   : > { %p1652_p12 = pnand %p1660_p11, %p1937_p6 }
 0x265   : > { %p1653_p13 = pneg %p1652_p12 }
 0x267   : > { %1845 = dma.done.wait (%p1653_p13), %s1207_s17, 8192  }
 0x268   : > { %1847 = vsyncadd (%p1653_p13), %s1207_s17, 4294959104  ;;  %p19_p0 = scmp.ge.s32.totalorder %s1960_s16, 6   ;;  %s2302_s18 = smov %s1854_s19 }
 0x269   : > { %s2303_s19 = smov %s1858_s20  ;;  %s2304_s20 = smov %s1969_s26 }
 0x26a   : > { %s2305_s21 = smov %s1960_s16  ;;  %21 = sbr.rel (!%p19_p0) target bundleno = 6 (0x6), region = 93 }
 0x26f   :  { %1213 = vsyncpa [#allocation3], 1 }
 0x270   :  { %1215 = vsyncpa [#allocation3 + $0x1], 1 }
 0x271   :  { %1216 = vsyncpa [#allocation6], 1 }
 0x272   :  { %1217 = vsyncpa [#allocation4], 1 }
 0x273   :  { %1219 = vsyncpa [#allocation4 + $0x1], 1 }

</bundles_post_ra>
